<compile_context>
chip_gen: v6e
topology: v6e:2x2x1
jax: 0.10.0
libtpu: 0.0.40
codegen_flags: <defaults>
</compile_context>

<pallas_src>
import functools

import jax
import jax.numpy as jnp
from jax.experimental import pallas as pl
from jax.experimental.pallas import tpu as pltpu


# ------------------------- Kernel 1: fused projections ----------------------

def _fused_proj_kernel(vis_ref, aud_ref, vw_ref, vb_ref, aw_ref, ab_ref,
                       wq_ref, bq_ref, wkv_ref, bkv_ref,
                       q_ref, kv_ref, *, scale, compute_dtype):
    f32 = jnp.float32
    vis = vis_ref[0].astype(compute_dtype)          # (Lq, vis_dim)
    aud = aud_ref[0].astype(compute_dtype)          # (Lk, aud_dim)

    # Modality projections (weights already (in, out): no in-kernel transpose).
    vis_p = (jnp.dot(vis, vw_ref[...].astype(compute_dtype),
                     preferred_element_type=f32) + vb_ref[...].astype(f32))
    aud_p = (jnp.dot(aud, aw_ref[...].astype(compute_dtype),
                     preferred_element_type=f32) + ab_ref[...].astype(f32))

    # MHA in-projection, fused.  Q is pre-scaled by 1/sqrt(Dh) here so the
    # attention kernel scales Lq*E elements once instead of Lq*Lk scores.
    q = (jnp.dot(vis_p.astype(compute_dtype), wq_ref[...].astype(compute_dtype),
                 preferred_element_type=f32) + bq_ref[...].astype(f32)) * scale
    kv = (jnp.dot(aud_p.astype(compute_dtype), wkv_ref[...].astype(compute_dtype),
                  preferred_element_type=f32) + bkv_ref[...].astype(f32))

    q_ref[0] = q.astype(q_ref.dtype)                # (Lq, E)   lane-dense
    kv_ref[0] = kv.astype(kv_ref.dtype)             # (Lk, 2E)  lane-dense


# --------------------- Kernel 2: attention + out-projection -----------------

def _attn_outproj_kernel(q_ref, kv_ref, ow_ref, ob_ref, o_ref, *,
                         num_heads, compute_dtype):
    f32 = jnp.float32
    E = q_ref.shape[-1]
    Dh = E // num_heads

    q = q_ref[0].astype(f32)                        # (Lq, E), pre-scaled
    kv = kv_ref[0].astype(f32)                      # (Lk, 2E)
    k = kv[:, :E]
    v = kv[:, E:]
    ow = ow_ref[...].astype(compute_dtype)          # (E, E), (in, out) layout

    out = ob_ref[...].astype(f32)                   # (1, E) -> broadcast over Lq
    for h in range(num_heads):                      # statically unrolled (H=8)
        sl = slice(h * Dh, (h + 1) * Dh)
        qh = q[:, sl].astype(compute_dtype)         # (Lq, Dh)
        kh = k[:, sl].astype(compute_dtype)         # (Lk, Dh)
        vh = v[:, sl]                               # (Lk, Dh)

        # scores = qh @ kh.T without materializing the transpose
        s = jax.lax.dot_general(qh, kh, (((1,), (1,)), ((), ())),
                                preferred_element_type=f32)      # (Lq, Lk)
        m = jnp.max(s, axis=-1, keepdims=True)
        p = jnp.exp(s - m)
        denom = jnp.sum(p, axis=-1, keepdims=True)
        # approx=False keeps the 1e-4 tolerance of this test; flip to True
        # (EUP vrcp) when a looser tolerance is acceptable.
        p = p * pl.reciprocal(denom, approx=False)               # softmax

        oh = jnp.dot(p.astype(compute_dtype), vh.astype(compute_dtype),
                     preferred_element_type=f32)                 # (Lq, Dh)
        # Fold head-merge into the out-projection: block-row matmul accumulate.
        out = out + jnp.dot(oh.astype(compute_dtype), ow[sl, :],
                            preferred_element_type=f32)          # (Lq, E)

    o_ref[0] = out.astype(o_ref.dtype)              # (Lq, E) lane-dense store


# --------------------------- Module forward (JAX glue) ----------------------

def cross_modal_attention(visual, audio, params, num_heads=8,
                          compute_dtype=jnp.float32):
    """Reproduces CrossModalAttention.forward(visual, audio)."""
    B, Lq, vis_dim = visual.shape
    _, Lk, aud_dim = audio.shape
    E = params["vis_w"].shape[0]
    Dh = E // num_heads
    scale = 1.0 / (Dh ** 0.5)
    dtype = visual.dtype

    # One-time weight prep in the wrapper (kept out of the kernel bodies):
    # transpose to (in, out) and pack K/V so the audio path is one E->2E matmul.
    wq, wk, wv = jnp.split(params["in_proj_w"], 3, axis=0)
    bq, bk, bv = jnp.split(params["in_proj_b"], 3, axis=0)
    vis_w_t = params["vis_w"].T                         # (vis_dim, E)
    aud_w_t = params["aud_w"].T                         # (aud_dim, E)
    wq_t = wq.T                                         # (E, E)
    wkv_t = jnp.concatenate([wk.T, wv.T], axis=1)       # (E, 2E)
    bkv = jnp.concatenate([bk, bv])                     # (2E,)
    out_w_t = params["out_w"].T                         # (E, E)

    # NOTE: for large Lq/Lk the per-batch block would also be tiled over the
    # sequence axis to respect the scoped-VMEM budget (32 MiB on v6e/v7x);
    # at these shapes one batch element easily fits.
    q, kv = pl.pallas_call(
        functools.partial(_fused_proj_kernel, scale=scale,
                          compute_dtype=compute_dtype),
        grid=(B,),
        in_specs=[
            pl.BlockSpec((1, Lq, vis_dim), lambda b: (b, 0, 0)),
            pl.BlockSpec((1, Lk, aud_dim), lambda b: (b, 0, 0)),
            pl.BlockSpec((vis_dim, E), lambda b: (0, 0)),
            pl.BlockSpec((1, E), lambda b: (0, 0)),
            pl.BlockSpec((aud_dim, E), lambda b: (0, 0)),
            pl.BlockSpec((1, E), lambda b: (0, 0)),
            pl.BlockSpec((E, E), lambda b: (0, 0)),
            pl.BlockSpec((1, E), lambda b: (0, 0)),
            pl.BlockSpec((E, 2 * E), lambda b: (0, 0)),
            pl.BlockSpec((1, 2 * E), lambda b: (0, 0)),
        ],
        out_specs=[
            pl.BlockSpec((1, Lq, E), lambda b: (b, 0, 0)),
            pl.BlockSpec((1, Lk, 2 * E), lambda b: (b, 0, 0)),
        ],
        out_shape=[
            jax.ShapeDtypeStruct((B, Lq, E), dtype),
            jax.ShapeDtypeStruct((B, Lk, 2 * E), dtype),
        ],
        compiler_params=pltpu.CompilerParams(dimension_semantics=("parallel",)),
    )(visual, audio,
      vis_w_t, params["vis_b"].reshape(1, E),
      aud_w_t, params["aud_b"].reshape(1, E),
      wq_t, bq.reshape(1, E),
      wkv_t, bkv.reshape(1, 2 * E))

    out = pl.pallas_call(
        functools.partial(_attn_outproj_kernel, num_heads=num_heads,
                          compute_dtype=compute_dtype),
        grid=(B,),
        in_specs=[
            pl.BlockSpec((1, Lq, E), lambda b: (b, 0, 0)),
            pl.BlockSpec((1, Lk, 2 * E), lambda b: (b, 0, 0)),
            pl.BlockSpec((E, E), lambda b: (0, 0)),
            pl.BlockSpec((1, E), lambda b: (0, 0)),
        ],
        out_specs=pl.BlockSpec((1, Lq, E), lambda b: (b, 0, 0)),
        out_shape=jax.ShapeDtypeStruct((B, Lq, E), dtype),
        compiler_params=pltpu.CompilerParams(dimension_semantics=("parallel",)),
    )(q, kv, out_w_t, params["out_b"].reshape(1, E))

    return out


# ------------------------------ Reference (plain JAX) -----------------------

def reference(visual, audio, params, num_heads=8):
    E = params["vis_w"].shape[0]
    Dh = E // num_heads
    B, Lq, _ = visual.shape
    _, Lk, _ = audio.shape

    vis_p = visual @ params["vis_w"].T + params["vis_b"]
    aud_p = audio @ params["aud_w"].T + params["aud_b"]

    wq, wk, wv = jnp.split(params["in_proj_w"], 3, axis=0)
    bq, bk, bv = jnp.split(params["in_proj_b"], 3, axis=0)
    q = (vis_p @ wq.T + bq).reshape(B, Lq, num_heads, Dh).transpose(0, 2, 1, 3)
    k = (aud_p @ wk.T + bk).reshape(B, Lk, num_heads, Dh).transpose(0, 2, 1, 3)
    v = (aud_p @ wv.T + bv).reshape(B, Lk, num_heads, Dh).transpose(0, 2, 1, 3)

    s = jnp.einsum("bhqd,bhkd->bhqk", q, k) / (Dh ** 0.5)
    p = jax.nn.softmax(s, axis=-1)
    o = jnp.einsum("bhqk,bhkd->bhqd", p, v).transpose(0, 2, 1, 3).reshape(B, Lq, E)
    return o @ params["out_w"].T + params["out_b"]


# ------------------------------ Param init ----------------------------------

def xavier_uniform(key, shape):
    fan_out, fan_in = shape
    limit = (6.0 / (fan_in + fan_out)) ** 0.5
    return jax.random.uniform(key, shape, jnp.float32, -limit, limit)


def init_params(key, vis_dim, aud_dim, hidden_dim):
    ks = jax.random.split(key, 8)
    return {
        "vis_w": xavier_uniform(ks[0], (hidden_dim, vis_dim)),
        "vis_b": 0.01 * jax.random.normal(ks[1], (hidden_dim,), jnp.float32),
        "aud_w": xavier_uniform(ks[2], (hidden_dim, aud_dim)),
        "aud_b": 0.01 * jax.random.normal(ks[3], (hidden_dim,), jnp.float32),
        "in_proj_w": xavier_uniform(ks[4], (3 * hidden_dim, hidden_dim)),
        "in_proj_b": jnp.zeros((3 * hidden_dim,), jnp.float32),
        "out_w": xavier_uniform(ks[5], (hidden_dim, hidden_dim)),
        "out_b": jnp.zeros((hidden_dim,), jnp.float32),
    }


# ------------------------------ Main -----------------------------------------

if __name__ == "__main__":
    key = jax.random.PRNGKey(0)
    k_vis, k_aud, k_par = jax.random.split(key, 3)

    B, Lq, Lk = 2, 8, 8
    vis_dim, aud_dim, hidden_dim, num_heads = 32, 16, 128, 8

    visual = jax.random.normal(k_vis, (B, Lq, vis_dim), jnp.float32)
    audio = jax.random.normal(k_aud, (B, Lk, aud_dim), jnp.float32)
    params = init_params(k_par, vis_dim, aud_dim, hidden_dim)

    out = cross_modal_attention(visual, audio, params, num_heads=num_heads)
    out = jax.block_until_ready(out)

    ref = reference(visual, audio, params, num_heads=num_heads)
    assert out.shape == (B, Lq, hidden_dim), out.shape
    assert jnp.allclose(out, ref, atol=2e-4, rtol=2e-4), float(jnp.max(jnp.abs(out - ref)))

    print("KERNEL_OK")
</pallas_src>

<mosaic_0001>
module attributes {stable_mosaic.version = 11 : i64} {
  func.func @_fused_proj_kernel(%arg0: i32, %arg1: memref<1x8x32xf32, #tpu.memory_space<vmem>>, %arg2: memref<1x8x16xf32, #tpu.memory_space<vmem>>, %arg3: memref<32x128xf32, #tpu.memory_space<vmem>>, %arg4: memref<1x128xf32, #tpu.memory_space<vmem>>, %arg5: memref<16x128xf32, #tpu.memory_space<vmem>>, %arg6: memref<1x128xf32, #tpu.memory_space<vmem>>, %arg7: memref<128x128xf32, #tpu.memory_space<vmem>>, %arg8: memref<1x128xf32, #tpu.memory_space<vmem>>, %arg9: memref<128x256xf32, #tpu.memory_space<vmem>>, %arg10: memref<1x256xf32, #tpu.memory_space<vmem>>, %arg11: memref<1x8x128xf32, #tpu.memory_space<vmem>>, %arg12: memref<1x8x256xf32, #tpu.memory_space<vmem>>) attributes {dimension_semantics = [#tpu.dimension_semantics<parallel>], iteration_bounds = array<i64: 2>, scalar_prefetch = 0 : i64, scratch_operands = 0 : i64, tpu.core_type = #tpu.core_type<tc>, window_params = [{transform_indices = @transform_0, window_bounds = array<i64: 1, 8, 32>}, {transform_indices = @transform_1, window_bounds = array<i64: 1, 8, 16>}, {pipeline_mode = #tpu.pipeline_mode<synchronous>, transform_indices = @transform_2, window_bounds = array<i64: 32, 128>}, {pipeline_mode = #tpu.pipeline_mode<synchronous>, transform_indices = @transform_3, window_bounds = array<i64: 1, 128>}, {pipeline_mode = #tpu.pipeline_mode<synchronous>, transform_indices = @transform_4, window_bounds = array<i64: 16, 128>}, {pipeline_mode = #tpu.pipeline_mode<synchronous>, transform_indices = @transform_5, window_bounds = array<i64: 1, 128>}, {pipeline_mode = #tpu.pipeline_mode<synchronous>, transform_indices = @transform_6, window_bounds = array<i64: 128, 128>}, {pipeline_mode = #tpu.pipeline_mode<synchronous>, transform_indices = @transform_7, window_bounds = array<i64: 1, 128>}, {pipeline_mode = #tpu.pipeline_mode<synchronous>, transform_indices = @transform_8, window_bounds = array<i64: 128, 256>}, {pipeline_mode = #tpu.pipeline_mode<synchronous>, transform_indices = @transform_9, window_bounds = array<i64: 1, 256>}, {transform_indices = @transform_10, window_bounds = array<i64: 1, 8, 128>}, {transform_indices = @transform_11, window_bounds = array<i64: 1, 8, 256>}]} {
    %c0 = arith.constant 0 : index
    %c0_0 = arith.constant 0 : index
    %c0_1 = arith.constant 0 : index
    %0 = vector.load %arg1[%c0, %c0_0, %c0_1] : memref<1x8x32xf32, #tpu.memory_space<vmem>>, vector<1x8x32xf32>
    %1 = vector.shape_cast %0 : vector<1x8x32xf32> to vector<8x32xf32>
    %c0_2 = arith.constant 0 : index
    %c0_3 = arith.constant 0 : index
    %c0_4 = arith.constant 0 : index
    %2 = vector.load %arg2[%c0_2, %c0_3, %c0_4] : memref<1x8x16xf32, #tpu.memory_space<vmem>>, vector<1x8x16xf32>
    %3 = vector.shape_cast %2 : vector<1x8x16xf32> to vector<8x16xf32>
    %c0_5 = arith.constant 0 : index
    %c0_6 = arith.constant 0 : index
    %4 = vector.load %arg3[%c0_5, %c0_6] : memref<32x128xf32, #tpu.memory_space<vmem>>, vector<32x128xf32>
    %cst = arith.constant dense<0.000000e+00> : vector<8x128xf32>
    %5 = tpu.matmul %1, %4, %cst {dimension_numbers = #tpu.dot_dimension_numbers<[1], [0], [0], [1], [0, 0, 1, 1], [], []>} : vector<8x32xf32>, vector<32x128xf32>, vector<8x128xf32> -> vector<8x128xf32>
    %c0_7 = arith.constant 0 : index
    %c0_8 = arith.constant 0 : index
    %6 = vector.load %arg4[%c0_7, %c0_8] : memref<1x128xf32, #tpu.memory_space<vmem>>, vector<1x128xf32>
    %7 = vector.broadcast %6 : vector<1x128xf32> to vector<8x128xf32>
    %8 = arith.addf %5, %7 : vector<8x128xf32>
    %c0_9 = arith.constant 0 : index
    %c0_10 = arith.constant 0 : index
    %9 = vector.load %arg5[%c0_9, %c0_10] : memref<16x128xf32, #tpu.memory_space<vmem>>, vector<16x128xf32>
    %cst_11 = arith.constant dense<0.000000e+00> : vector<8x128xf32>
    %10 = tpu.matmul %3, %9, %cst_11 {dimension_numbers = #tpu.dot_dimension_numbers<[1], [0], [0], [1], [0, 0, 1, 1], [], []>} : vector<8x16xf32>, vector<16x128xf32>, vector<8x128xf32> -> vector<8x128xf32>
    %c0_12 = arith.constant 0 : index
    %c0_13 = arith.constant 0 : index
    %11 = vector.load %arg6[%c0_12, %c0_13] : memref<1x128xf32, #tpu.memory_space<vmem>>, vector<1x128xf32>
    %12 = vector.broadcast %11 : vector<1x128xf32> to vector<8x128xf32>
    %13 = arith.addf %10, %12 : vector<8x128xf32>
    %c0_14 = arith.constant 0 : index
    %c0_15 = arith.constant 0 : index
    %14 = vector.load %arg7[%c0_14, %c0_15] : memref<128x128xf32, #tpu.memory_space<vmem>>, vector<128x128xf32>
    %cst_16 = arith.constant dense<0.000000e+00> : vector<8x128xf32>
    %15 = tpu.matmul %8, %14, %cst_16 {dimension_numbers = #tpu.dot_dimension_numbers<[1], [0], [0], [1], [0, 0, 1, 1], [], []>} : vector<8x128xf32>, vector<128x128xf32>, vector<8x128xf32> -> vector<8x128xf32>
    %c0_17 = arith.constant 0 : index
    %c0_18 = arith.constant 0 : index
    %16 = vector.load %arg8[%c0_17, %c0_18] : memref<1x128xf32, #tpu.memory_space<vmem>>, vector<1x128xf32>
    %17 = vector.broadcast %16 : vector<1x128xf32> to vector<8x128xf32>
    %18 = arith.addf %15, %17 : vector<8x128xf32>
    %cst_19 = arith.constant 2.500000e-01 : f32
    %19 = vector.broadcast %cst_19 : f32 to vector<8x128xf32>
    %20 = arith.mulf %18, %19 : vector<8x128xf32>
    %c0_20 = arith.constant 0 : index
    %c0_21 = arith.constant 0 : index
    %21 = vector.load %arg9[%c0_20, %c0_21] : memref<128x256xf32, #tpu.memory_space<vmem>>, vector<128x256xf32>
    %cst_22 = arith.constant dense<0.000000e+00> : vector<8x256xf32>
    %22 = tpu.matmul %13, %21, %cst_22 {dimension_numbers = #tpu.dot_dimension_numbers<[1], [0], [0], [1], [0, 0, 1, 1], [], []>} : vector<8x128xf32>, vector<128x256xf32>, vector<8x256xf32> -> vector<8x256xf32>
    %c0_23 = arith.constant 0 : index
    %c0_24 = arith.constant 0 : index
    %23 = vector.load %arg10[%c0_23, %c0_24] : memref<1x256xf32, #tpu.memory_space<vmem>>, vector<1x256xf32>
    %24 = vector.broadcast %23 : vector<1x256xf32> to vector<8x256xf32>
    %25 = arith.addf %22, %24 : vector<8x256xf32>
    %c0_25 = arith.constant 0 : index
    %c0_26 = arith.constant 0 : index
    %c0_27 = arith.constant 0 : index
    %26 = vector.load %arg11[%c0_25, %c0_26, %c0_27] : memref<1x8x128xf32, #tpu.memory_space<vmem>>, vector<1x8x128xf32>
    %27 = vector.shape_cast %26 : vector<1x8x128xf32> to vector<8x128xf32>
    %28 = vector.shape_cast %20 : vector<8x128xf32> to vector<1x8x128xf32>
    tpu.vector_store %arg11[%c0_25, %c0_26, %c0_27], %28 {strides = array<i32>} : memref<1x8x128xf32, #tpu.memory_space<vmem>>, vector<1x8x128xf32>,
    %c0_28 = arith.constant 0 : index
    %c0_29 = arith.constant 0 : index
    %c0_30 = arith.constant 0 : index
    %29 = vector.load %arg12[%c0_28, %c0_29, %c0_30] : memref<1x8x256xf32, #tpu.memory_space<vmem>>, vector<1x8x256xf32>
    %30 = vector.shape_cast %29 : vector<1x8x256xf32> to vector<8x256xf32>
    %31 = vector.shape_cast %25 : vector<8x256xf32> to vector<1x8x256xf32>
    tpu.vector_store %arg12[%c0_28, %c0_29, %c0_30], %31 {strides = array<i32>} : memref<1x8x256xf32, #tpu.memory_space<vmem>>, vector<1x8x256xf32>,
    return
  }
  func.func @transform_0(%arg0: i32) -> (i32, i32, i32) {
    %c0_i32 = arith.constant 0 : i32
    %c0_i32_0 = arith.constant 0 : i32
    %c0_i32_1 = arith.constant 0 : i32
    return %arg0, %c0_i32, %c0_i32_0 : i32, i32, i32
  }
  func.func @transform_1(%arg0: i32) -> (i32, i32, i32) {
    %c0_i32 = arith.constant 0 : i32
    %c0_i32_0 = arith.constant 0 : i32
    %c0_i32_1 = arith.constant 0 : i32
    return %arg0, %c0_i32, %c0_i32_0 : i32, i32, i32
  }
  func.func @transform_2(%arg0: i32) -> (i32, i32) {
    %c0_i32 = arith.constant 0 : i32
    %c0_i32_0 = arith.constant 0 : i32
    %c0_i32_1 = arith.constant 0 : i32
    return %c0_i32, %c0_i32_0 : i32, i32
  }
  func.func @transform_3(%arg0: i32) -> (i32, i32) {
    %c0_i32 = arith.constant 0 : i32
    %c0_i32_0 = arith.constant 0 : i32
    %c0_i32_1 = arith.constant 0 : i32
    return %c0_i32, %c0_i32_0 : i32, i32
  }
  func.func @transform_4(%arg0: i32) -> (i32, i32) {
    %c0_i32 = arith.constant 0 : i32
    %c0_i32_0 = arith.constant 0 : i32
    %c0_i32_1 = arith.constant 0 : i32
    return %c0_i32, %c0_i32_0 : i32, i32
  }
  func.func @transform_5(%arg0: i32) -> (i32, i32) {
    %c0_i32 = arith.constant 0 : i32
    %c0_i32_0 = arith.constant 0 : i32
    %c0_i32_1 = arith.constant 0 : i32
    return %c0_i32, %c0_i32_0 : i32, i32
  }
  func.func @transform_6(%arg0: i32) -> (i32, i32) {
    %c0_i32 = arith.constant 0 : i32
    %c0_i32_0 = arith.constant 0 : i32
    %c0_i32_1 = arith.constant 0 : i32
    return %c0_i32, %c0_i32_0 : i32, i32
  }
  func.func @transform_7(%arg0: i32) -> (i32, i32) {
    %c0_i32 = arith.constant 0 : i32
    %c0_i32_0 = arith.constant 0 : i32
    %c0_i32_1 = arith.constant 0 : i32
    return %c0_i32, %c0_i32_0 : i32, i32
  }
  func.func @transform_8(%arg0: i32) -> (i32, i32) {
    %c0_i32 = arith.constant 0 : i32
    %c0_i32_0 = arith.constant 0 : i32
    %c0_i32_1 = arith.constant 0 : i32
    return %c0_i32, %c0_i32_0 : i32, i32
  }
  func.func @transform_9(%arg0: i32) -> (i32, i32) {
    %c0_i32 = arith.constant 0 : i32
    %c0_i32_0 = arith.constant 0 : i32
    %c0_i32_1 = arith.constant 0 : i32
    return %c0_i32, %c0_i32_0 : i32, i32
  }
  func.func @transform_10(%arg0: i32) -> (i32, i32, i32) {
    %c0_i32 = arith.constant 0 : i32
    %c0_i32_0 = arith.constant 0 : i32
    %c0_i32_1 = arith.constant 0 : i32
    return %arg0, %c0_i32, %c0_i32_0 : i32, i32, i32
  }
  func.func @transform_11(%arg0: i32) -> (i32, i32, i32) {
    %c0_i32 = arith.constant 0 : i32
    %c0_i32_0 = arith.constant 0 : i32
    %c0_i32_1 = arith.constant 0 : i32
    return %arg0, %c0_i32, %c0_i32_0 : i32, i32, i32
  }
}

</mosaic_0001>

<bundles_post_ra>
// kernel: tpu_custom_call.1
= control target key start
LH: loop header
LB: loop body
LE: loop exit
PB: predicated region body
PF: predicated region fallthrough
CT: control target
= control target key end

     0   :  { %s1987_s0 = inlined_call_operand.hbm [shape: f32[2,8,32], index: 0, kind: input, shape index: {}]   ;;  %s1988_s1 = inlined_call_operand.hbm [shape: f32[2,8,16], index: 1, kind: input, shape index: {}]   ;;  %s1989_s2 = inlined_call_operand.hbm [shape: f32[32,128], index: 2, kind: input, shape index: {}]   ;;  %s1990_s3 = inlined_call_operand.vmem [shape: f32[1,128], index: 3, kind: input, shape index: {}]   ;;  %s1991_s4 = inlined_call_operand.hbm [shape: f32[16,128], index: 4, kind: input, shape index: {}]   ;;  %s1992_s5 = inlined_call_operand.vmem [shape: f32[1,128], index: 5, kind: input, shape index: {}]   ;;  %s1993_s6 = inlined_call_operand.hbm [shape: f32[128,128], index: 6, kind: input, shape index: {}]   ;;  %s1994_s7 = inlined_call_operand.vmem [shape: f32[1,128], index: 7, kind: input, shape index: {}]   ;;  %s1995_s8 = inlined_call_operand.hbm [shape: f32[128,256], index: 8, kind: input, shape index: {}]   ;;  %s1996_s9 = inlined_call_operand.vmem [shape: f32[1,256], index: 9, kind: input, shape index: {}]   ;;  %s1997_s10 = inlined_call_operand.hbm [shape: f32[2,8,128], index: 10, kind: output, shape index: {0}]   ;;  %s1998_s11 = inlined_call_operand.hbm [shape: f32[2,8,256], index: 11, kind: output, shape index: {1}]  }
   0x1   :  { %2007 = sst [smem:[#allocation27_spill]] %s1989_s2 }
   0x2   :  { %2008 = sst [smem:[#allocation28_spill]] %s1991_s4 }
   0x3   :  { %2009 = sst [smem:[#allocation29_spill]] %s1993_s6 }
   0x4   :  { %2010 = sst [smem:[#allocation30_spill]] %s1995_s8 }
   0x5   :  { %17 = vsyncpa [#allocation3], 0 }
   0x6   :  { %19 = vsyncpa [#allocation3 + $0x1], 0 }
   0x7   :  { %20 = vsyncpa [#allocation6], 0 }
   0x8   :  { %22 = vsyncpa [#allocation6 + $0x1], 0 }
   0x9   :  { %23 = vsyncpa [#allocation9], 0 }
   0xa   :  { %24 = vsyncpa [#allocation12], 0 }
   0xb   :  { %25 = vsyncpa [#allocation4], 0 }
   0xc   :  { %27 = vsyncpa [#allocation4 + $0x1], 0 }
   0xd   :  { %28 = vsyncpa [#allocation15], 0 }
   0xe   :  { %30 = vsyncpa [#allocation15 + $0x1], 0  ;;  %s1646_s17 = smov 0   ;;  %s1648_s18 = smov 0  }
   0xf   :  { %s1650_s19 = smov 0   ;;  %s1652_s20 = smov 0  }
  0x10 LB: > { %2011 = sst [smem:[#allocation23_spill]] %s1566_s19  ;;  %s1572_s21 = smov [#allocation7]   ;;  %s1570_s20 = sphi %s1652_s20, %s2038_s20   ;;  %s1566_s19 = sphi %s1650_s19, %s2040_s19   ;;  %s1562_s18 = sphi %s1648_s18, %s2042_s18   ;;  %s1558_s17 = sphi %s1646_s17, %s2041_s17  }
  0x11   : > { %s325_s22 = sshll.u32 %s1572_s21, 4  ;;  %s1667_s23 = sadd.s32 4294967295, %s1570_s20   ;;  %s326_s22 = int_to_ptr.vmem [resolvable:$true] %s325_s22 }
  0x12   : > { %p1087_p0 = scmp.ge.s32.totalorder %s1570_s20, 1  ;;  %p2003_p1 = scmp.eq.s32.totalorder %s1667_s23, 0 }
  0x13   : > { %p313_p2 = scmp.lt.s32.totalorder %s1570_s20, 3  ;;  %s1573_s25 = smov [#allocation8]  }
  0x14   : > { %s341_s26 = sshll.u32 %s1573_s25, 4  ;;  %s1574_s28 = smov [#allocation10]   ;;  %s1685_s26 = int_to_ptr.vmem [resolvable:$true] %s341_s26 }
  0x15   : > { %p1672_p3 = pnand %p1087_p0, %p313_p2  ;;  %s357_s29 = sshll.u32 %s1574_s28, 4  ;;  %s1687_s29 = int_to_ptr.vmem [resolvable:$true] %s357_s29 }
  0x16   : > { %s1311_s30 = scalar_lea.vmem %s326_s22, 512  ;;  %p1319_p11 = scmp.lt.s32.totalorder %s326_s22, %s326_s22 }
  0x17   : > { %s2012_s24 = scalar_select %p1672_p3, 1, 0 }
  0x18   : > { %p1221_p5 = pneg %p1672_p3  ;;  %p1312_p8 = scmp.ne.s32.totalorder %s326_s22, %s1311_s30 }
  0x19   : > { %p1320_p12 = scmp.lt.s32.totalorder %s1311_s30, %s1311_s30 }
  0x1a   : > { %p1681_p6 = pnand %p1221_p5, %p2003_p1 }
  0x1b   : > { %p1321_p13 = por %p1320_p12, %p1319_p11 }
  0x1c   : > { %p1302_p7 = pneg %p1681_p6 }
  0x1e   : > { %p1314_p9 = pnand %p1312_p8, %p1302_p7 }
  0x20   : > { %p1315_p10 = pneg %p1314_p9 }
  0x22   : > { %p1322_p0 = pnand %p1321_p13, %p1315_p10 }
  0x24   : > { %1325 = shalt.err (!%p1322_p0)
}
  0x25   : > { %s1575_s12 = smov 128   ;;  %s1576_s13 = smov 8  }
  0x26   : > { %s2014_s2 = sld [smem:[#allocation27_spill]]  ;;  %s1337_s16 = scalar_lea.vmem %s1685_s26, 256 }
  0x27   : > { %p1338_p2 = scmp.ne.s32.totalorder %s1685_s26, %s1337_s16  ;;  %p1345_p9 = scmp.lt.s32.totalorder %s1685_s26, %s1685_s26 }
  0x28   : > { %p1346_p10 = scmp.lt.s32.totalorder %s1337_s16, %s1337_s16 }
  0x29   : > { %p1340_p5 = pnand %p1338_p2, %p1302_p7 }
  0x2a   : > { %p1347_p11 = por %p1346_p10, %p1345_p9 }
  0x2b   : > { %p1341_p8 = pneg %p1340_p5 }
  0x2c   : > { %1224 = dma.hbm_to_vmem [thread:$0]  (!%p1681_p6), %s2014_s2, 512, %s326_s22, [#allocation6], %s1575_s12, %s1575_s12, %s1576_s13  }
  0x2d   : > { %p1348_p12 = pnand %p1347_p11, %p1341_p8 }
  0x2f   : > { %1351 = shalt.err (!%p1348_p12)
}
  0x30   : > { %s2015_s4 = sld [smem:[#allocation28_spill]]  ;;  %s1363_s22 = scalar_lea.vmem %s1687_s29, 2048 }
  0x31   : > { %p1364_p13 = scmp.ne.s32.totalorder %s1687_s29, %s1363_s22  ;;  %p1371_p5 = scmp.lt.s32.totalorder %s1687_s29, %s1687_s29 }
  0x32   : > { %p1372_p8 = scmp.lt.s32.totalorder %s1363_s22, %s1363_s22 }
  0x33   : > { %p1366_p0 = pnand %p1364_p13, %p1302_p7 }
  0x34   : > { %p1373_p9 = por %p1372_p8, %p1371_p5 }
  0x35   : > { %p1367_p2 = pneg %p1366_p0 }
  0x36   : > { %1227 = dma.hbm_to_vmem [thread:$0]  (!%p1681_p6), %s2015_s4, 256, %s1685_s26, [#allocation9], %s1575_s12, %s1575_s12, %s1576_s13  }
  0x37   : > { %p1374_p10 = pnand %p1373_p9, %p1367_p2 }
  0x39   : > { %1377 = shalt.err (!%p1374_p10)
}
  0x3a   : > { %s2016_s6 = sld [smem:[#allocation29_spill]]  ;;  %s1577_s26 = smov [#allocation11]  }
  0x3b   : > { %s373_s14 = sshll.u32 %s1577_s26, 4  ;;  %s374_s14 = int_to_ptr.vmem [resolvable:$true] %s373_s14 }
  0x3c   : > { %s1389_s15 = scalar_lea.vmem %s374_s14, 4096  ;;  %p1397_p0 = scmp.lt.s32.totalorder %s374_s14, %s374_s14 }
  0x3d   : > { %p1390_p11 = scmp.ne.s32.totalorder %s374_s14, %s1389_s15  ;;  %p1398_p2 = scmp.lt.s32.totalorder %s1389_s15, %s1389_s15 }
  0x3f   : > { %p1392_p12 = pnand %p1390_p11, %p1302_p7  ;;  %p1399_p5 = por %p1398_p2, %p1397_p0 }
  0x40   : > { %1230 = dma.hbm_to_vmem [thread:$0]  (!%p1681_p6), %s2016_s6, 2048, %s1687_s29, [#allocation9], %s1575_s12, %s1575_s12, %s1576_s13  }
  0x41   : > { %p1393_p13 = pneg %p1392_p12 }
  0x43   : > { %p1400_p8 = pnand %p1399_p5, %p1393_p13 }
  0x45   : > { %1403 = shalt.err (!%p1400_p8)
}
  0x46   : > { %s1578_s16 = smov 256   ;;  %s1579_s29 = smov 16  }
  0x47   : > { %s2017_s8 = sld [smem:[#allocation30_spill]]  ;;  %s1086_s21 = sadd.s32 4294967294, %s1570_s20  }
  0x48   : > { %s1735_s25 = sadd.s32 1, %s1570_s20   ;;  %s43_s28 = sadd.s32 1, %s1566_s19 }
  0x49   : > { %2018 = sst [smem:[#allocation24_spill]] %s1735_s25  ;;  %s40_s22 = ssub.s32 %s1570_s20, %s1735_s25 }
  0x4a   : > { %p41_p7 = scmp.eq.s32.totalorder %s40_s22, 0  ;;  %p50_p9 = scmp.ne.s32.totalorder %s1566_s19, %s1562_s18 }
  0x4b   : > { %p51_p10 = scmp.eq.s32.totalorder %s1570_s20, 0  ;;  %p56_p11 = scmp.ne.s32.totalorder %s1562_s18, %s1558_s17 }
  0x4c   : > { %s1746_s30 = scalar_select %p41_p7, %s1566_s19, %s43_s28  }
  0x4d   : > { %1233 = dma.hbm_to_vmem [thread:$0]  (!%p1681_p6), %s2017_s8, 4096, %s374_s14, [#allocation12], %s1578_s16, %s1578_s16, %s1579_s29  }
  0x4e   : > { %2019 = sst [smem:[#allocation25_spill]] %s1746_s30  ;;  %p1748_p12 = por %p51_p10, %p50_p9 }
  0x4f   : > { %p1754_p6 = por %p2003_p1, %p56_p11  ;;  %p274_p13 = scmp.eq.s32.totalorder %s1667_s23, 1 }
  0x50   : > { %p280_p0 = scmp.eq.s32.totalorder %s1086_s21, 1  ;;  %p1252_p2 = scmp.lt.s32.totalorder %s1570_s20, 2 }
  0x51   : > { %s2021_s26 = scalar_select %p1754_p6, 1, 0 }
  0x52   : > { %s390_s14 = sand.u32 1, %s1566_s19   ;;  %p1761_p5 = por %p274_p13, %p50_p9 }
  0x53   : > { %p1765_p8 = por %p280_p0, %p56_p11  ;;  %s1769_s29 = sshll.u32 %s390_s14, 3 }
  0x54   : > { %s2022_s15 = scalar_select %p1761_p5, 1, 0 }
  0x55   : > { %s2023_s16 = scalar_select %p1765_p8, 1, 0 }
  0x56   : > { %s1094_s12 = sshll.u32 %s1570_s20, 7  ;;  %s394_s21 = scalar_lea.vmem [#allocation2], %s1769_s29 }
  0x57   : > { %2024 = sst [smem:[#allocation26_spill]] %s2023_s16  ;;  %s1775_s28 = scalar_lea.hbm %s1987_s0, %s1094_s12 }
  0x58   : > { %s401_s2 = sshll.u32 %s394_s21, 4  ;;  %p1782_p7 = pnand %p1252_p2, %p1748_p12  ;;  %s1778_s2 = int_to_ptr.vmem [resolvable:$true] %s401_s2 }
  0x59   : > { %s1789_s13 = scalar_lea.hbm %s1988_s1, %s1094_s12  ;;  %s408_s22 = sand.u32 1, %s1570_s20  }
  0x5a   : > { %s391_s30 = scalar_lea.sflag [#allocation3], %s390_s14  ;;  %s1404_s19 = scalar_lea.hbm %s1775_s28, 128 }
  0x5b   : > { %p1405_p9 = scmp.ne.s32.totalorder %s1775_s28, %s1404_s19  ;;  %p1406_p10 = pneg %p1782_p7 }
  0x5c   : > { %s1409_s25 = scalar_lea.hbm %s1987_s0, 256  ;;  %p1410_p13 = scmp.lt.s32.totalorder %s1775_s28, %s1987_s0 }
  0x5d   : > { %p1407_p11 = pnand %p1406_p10, %p1405_p9  ;;  %p1411_p0 = scmp.lt.s32.totalorder %s1409_s25, %s1404_s19 }
  0x5f   : > { %p1408_p12 = pneg %p1407_p11  ;;  %p1412_p2 = por %p1411_p0, %p1410_p13 }
  0x61   : > { %p1413_p4 = pnand %p1412_p2, %p1408_p12 }
  0x63   : > { %1416 = shalt.err (!%p1413_p4)
}
  0x64   : > { %s1417_s8 = scalar_lea.vmem %s1778_s2, 128  ;;  %s1580_s14 = smov [#allocation2]  }
  0x65   : > { %p1418_p1 = scmp.ne.s32.totalorder %s1778_s2, %s1417_s8  ;;  %s1422_s12 = sshll.u32 %s1580_s14, 4  ;;  %s1423_s12 = int_to_ptr.vmem [resolvable:$false] %s1422_s12 }
  0x66   : > { %s1424_s27 = scalar_lea.vmem %s1423_s12, 256  ;;  %p1425_p8 = scmp.lt.s32.totalorder %s1778_s2, %s1423_s12 }
  0x67   : > { %p1420_p9 = pnand %p1418_p1, %p1406_p10  ;;  %p1426_p5 = scmp.lt.s32.totalorder %s1424_s27, %s1417_s8 }
  0x69   : > { %p1421_p11 = pneg %p1420_p9  ;;  %p1427_p6 = por %p1426_p5, %p1425_p8 }
  0x6b   : > { %p1428_p13 = pnand %p1427_p6, %p1421_p11 }
  0x6d   : > { %1431 = shalt.err (!%p1428_p13)
}
  0x6e   : > { %1237 = dma.hbm_to_vmem [thread:$0]  (!%p1782_p7), %s1775_s28, 128, %s1778_s2, %s391_s30  }
  0x6f   : > { %s412_s19 = scalar_lea.vmem [#allocation5], %s1769_s29  ;;  %s409_s16 = scalar_lea.sflag [#allocation6], %s408_s22 }
  0x70   : > { %s419_s25 = sshll.u32 %s412_s19, 4  ;;  %s1432_s21 = scalar_lea.hbm %s1789_s13, 128  ;;  %s420_s25 = int_to_ptr.vmem [resolvable:$true] %s419_s25 }
  0x71   : > { %p1433_p1 = scmp.ne.s32.totalorder %s1789_s13, %s1432_s21  ;;  %s1437_s14 = scalar_lea.hbm %s1988_s1, 256 }
  0x72   : > { %p1438_p5 = scmp.lt.s32.totalorder %s1789_s13, %s1988_s1  ;;  %p1439_p8 = scmp.lt.s32.totalorder %s1437_s14, %s1432_s21 }
  0x73   : > { %p1435_p4 = pnand %p1433_p1, %p1406_p10 }
  0x74   : > { %p1440_p12 = por %p1439_p8, %p1438_p5 }
  0x75   : > { %p1436_p6 = pneg %p1435_p4 }
  0x77   : > { %p1441_p0 = pnand %p1440_p12, %p1436_p6 }
  0x79   : > { %1444 = shalt.err (!%p1441_p0)
}
  0x7a   : > { %s1445_s2 = scalar_lea.vmem %s420_s25, 128  ;;  %s1581_s30 = smov [#allocation5]  }
  0x7b   : > { %p1446_p2 = scmp.ne.s32.totalorder %s420_s25, %s1445_s2  ;;  %s1450_s29 = sshll.u32 %s1581_s30, 4  ;;  %s1451_s29 = int_to_ptr.vmem [resolvable:$false] %s1450_s29 }
  0x7c   : > { %s1452_s28 = scalar_lea.vmem %s1451_s29, 256  ;;  %p1453_p13 = scmp.lt.s32.totalorder %s420_s25, %s1451_s29 }
  0x7d   : > { %p1448_p9 = pnand %p1446_p2, %p1406_p10  ;;  %p1454_p1 = scmp.lt.s32.totalorder %s1452_s28, %s1445_s2 }
  0x7f   : > { %p1449_p11 = pneg %p1448_p9  ;;  %p1455_p4 = por %p1454_p1, %p1453_p13 }
  0x81   : > { %p1456_p3 = pnand %p1455_p4, %p1449_p11 }
  0x83   : > { %1459 = shalt.err (!%p1456_p3)
}
  0x84   : > { %1240 = dma.hbm_to_vmem [thread:$0]  (!%p1782_p7), %s1789_s13, 128, %s420_s25, %s409_s16  }
  0x85   : > { %p2026_p6 = scmp.ne.s32.totalorder %s2012_s24, 0 }
  0x86   : > { %s1840_s22 = sand.u32 (!%p2026_p6), 1, %s1562_s18   ;;  %p2027_p10 = scmp.ne.s32.totalorder (!%p2026_p6), %s2021_s26, 0 }
  0x87   : > { %428 = sbr.rel (%p2026_p6) target bundleno = 587 (0x24b), region = 60  ;;  %s1843_s19 = sshll.u32 (!%p2026_p6), %s1840_s22, 3 }
  0x88   : > { %s431_s21 = scalar_lea.sflag (!%p2026_p6), [#allocation3], %s1840_s22  ;;  %s434_s6 = scalar_lea.vmem (!%p2026_p6), [#allocation2], %s1843_s19 }
  0x8c   : > { %1529 = dma.done.wait (%p2027_p10), %s431_s21, 128  }
  0x8d   : > { %1531 = vsyncadd (%p2027_p10), %s431_s21, 4294967168  ;;  %s439_s4 = sand.u32 1, %s1667_s23   ;;  %s443_s13 = scalar_lea.vmem [#allocation5], %s1843_s19 }
  0x8e   : > { %s440_s24 = scalar_lea.sflag [#allocation6], %s439_s4 }
  0x8f   : > { %1533 = dma.done.wait (%p2027_p10), %s440_s24, 128  }
  0x90   : > { %1535 = vsyncadd (%p2027_p10), %s440_s24, 4294967168  ;;  %p2028_p3 = scmp.eq.s32.totalorder %s1667_s23, 0 }
  0x92   : > { %1537 = dma.done.wait (%p2028_p3), [#allocation6], 512   ;;  %p2029_p7 = pmov %p2028_p3 }
  0x93   : > { %p2030_p5 = pmov %p2028_p3 }
  0x94   : > { %1539 = vsyncadd (%p2029_p7), [#allocation6], 4294966784 }
  0x95   : > { %1541 = dma.done.wait (%p2030_p5), [#allocation9], 2304   ;;  %p2031_p8 = pmov %p2028_p3 }
  0x96   : > { %p2032_p12 = pmov %p2028_p3 }
  0x97   : > { %1543 = vsyncadd (%p2031_p8), [#allocation9], 4294964992 }
  0x98   : > { %1545 = dma.done.wait (%p2032_p12), [#allocation12], 4096   ;;  %p2033_p0 = pmov %p2028_p3 }
  0x99   : > { %v1582_v0 = vmov 0.0   ;;  %vm1583_vm0 = vmmov 0   ;;  %v513_v1 = vld [vmem:[#allocation7 + $0x18] sm:$0xff]  ;;  %v512_v2 = vld [vmem:[#allocation7 + $0x10] sm:$0xff]  ;;  %v596_v3 = vld [vmem:[#allocation8 + $0x8] sm:$0xff]  ;;  %vm604_vm1 = vcmask 130048  }
  0x9a   : > { %1547 = vsyncadd (%p2033_p0), [#allocation12], 4294963200  ;;  %1144 = vmatprep.subr.mxu0 %v1582_v0  ;;  %1155 = vmatprep.subr.mxu1 %v1582_v0  ;;  %v595_v4 = vld [vmem:[#allocation8] sm:$0xff]  ;;  %v509_v5 = vld [vmem:[%s443_s13] sm:$0xff]  ;;  %vm521_vm2 = vcmask 261120   ;;  %s1105_s14 = sshll.u32 %s1840_s22, 4 }
  0x9b   : > { %1159 = vmatprep.mubr.msk.f32.mxu1 %vm1583_vm0, %v1582_v0  ;;  %1152 = vmatprep.mubr.msk.f32.mxu0 %vm1583_vm0, %v1582_v0  ;;  %v511_v6 = vld [vmem:[#allocation7 + $0x8] sm:$0xff]  ;;  %v510_v8 = vld [vmem:[#allocation7] sm:$0xff]  ;;  %v801_v13 = vld [vmem:[#allocation11 + $0xe8] sm:$0xff]  ;;  %s1118_s2 = sshll.u32 %s1667_s23, 8  ;;  %s507_s30 = scalar_lea.vmem [#allocation14], %s1105_s14 }
  0x9c   : > { %1145 = vmatpush3.msra.mxu0 %v513_v1  ;;  %1156 = vmatpush3.msra.mxu1 %v596_v3  ;;  %v693_v7 = vld [vmem:[#allocation10 + $0x78] sm:$0xff]  ;;  %v802_v11 = vld [vmem:[#allocation11 + $0xf0] sm:$0xff]  ;;  %v800_v14 = vld [vmem:[#allocation11 + $0xe0] sm:$0xff]  ;;  %s923_s29 = sshll.u32 %s507_s30, 4  ;;  %s1917_s24 = scalar_lea.hbm %s1998_s11, %s1118_s2  ;;  %s1919_s29 = int_to_ptr.vmem [resolvable:$true] %s923_s29 }
  0x9d   : > { %1146 = vmatprep.subr.mxu0 %v1582_v0  ;;  %1157 = vmatprep.subr.mxu1 %v1582_v0  ;;  %v508_v9 = vld [vmem:[%s434_s6] sm:$0xff]  ;;  %v691_v15 = vld [vmem:[#allocation10 + $0x68] sm:$0xff]  ;;  %v690_v18 = vld [vmem:[#allocation10 + $0x60] sm:$0xff]  ;;  %s1113_s13 = sshll.u32 %s1667_s23, 7  ;;  %s500_s26 = scalar_lea.vmem [#allocation13], %s1843_s19 }
  0x9e   : > { %1147 = vmatpush3.msra.mxu0 %v512_v2  ;;  %1158 = vmatpush3.msra.mxu1 %v595_v4  ;;  %v803_v10 = vld [vmem:[#allocation11 + $0xf8] sm:$0xff]  ;;  %v692_v12 = vld [vmem:[#allocation10 + $0x70] sm:$0xff]  ;;  %v797_v19 = vld [vmem:[#allocation11 + $0xc8] sm:$0xff]  ;;  %s1925_s25 = sshll.u32 %s500_s26, 4  ;;  %s896_s16 = scalar_lea.sflag [#allocation15], %s1840_s22  ;;  %s910_s25 = int_to_ptr.vmem [resolvable:$true] %s1925_s25 }
  0x9f   : > { %1148 = vmatprep.subr.mxu0 %v1582_v0  ;;  %1160 = vmatmul.mubr.msk.f32.vlgmr.msra.gmra.mxu1 %vm604_vm1, %v509_v5  ;;  %v799_v16 = vld [vmem:[#allocation11 + $0xd8] sm:$0xff]  ;;  %v798_v17 = vld [vmem:[#allocation11 + $0xd0] sm:$0xff]  ;;  %v796_v20 = vld [vmem:[#allocation11 + $0xc0] sm:$0xff]  ;;  %s1460_s8 = scalar_lea.vmem %s1919_s29, 256  ;;  %p2034_p9 = scmp.ne.s32.totalorder %s2022_s15, 0 }
  0xa0   : > { %1149 = vmatpush3.msra.mxu0 %v511_v6  ;;  %1162 = vmatprep.subr.mxu1 %v1582_v0  ;;  %v689_v21 = vld [vmem:[#allocation10 + $0x58] sm:$0xff]  ;;  %v794_v23 = vld [vmem:[#allocation11 + $0xb0] sm:$0xff]  ;;  %v793_v25 = vld [vmem:[#allocation11 + $0xa8] sm:$0xff]  ;;  %p1461_p2 = scmp.ne.s32.totalorder %s1919_s29, %s1460_s8  ;;  %s1584_s14 = smov [#allocation14]  }
  0xa1   : > { %1150 = vmatprep.subr.mxu0 %v1582_v0  ;;  %1163 = vmatpush3.msra.mxu1 %v693_v7  ;;  %v795_v22 = vld [vmem:[#allocation11 + $0xb8] sm:$0xff]  ;;  %v688_v24 = vld [vmem:[#allocation10 + $0x50] sm:$0xff]  ;;  %v792_v26 = vld [vmem:[#allocation11 + $0xa0] sm:$0xff]  ;;  %s1464_s12 = sshll.u32 %s1584_s14, 4  ;;  %s1465_s12 = int_to_ptr.vmem [resolvable:$false] %s1464_s12 }
  0xa2   : > { %1151 = vmatpush3.msra.mxu0 %v510_v8  ;;  %1164 = vmatprep.subr.mxu1 %v1582_v0  ;;  %v687_v27 = vld [vmem:[#allocation10 + $0x48] sm:$0xff]  ;;  %v791_v28 = vld [vmem:[#allocation11 + $0x98] sm:$0xff]  ;;  %v790_v29 = vld [vmem:[#allocation11 + $0x90] sm:$0xff]  ;;  %p1462_p11 = pnand %p1461_p2, %p2034_p9  ;;  %s1466_s27 = scalar_lea.vmem %s1465_s12, 512 }
  0xa3   : > { %1153 = vmatmul.mubr.msk.f32.vlgmr.msra.gmra.mxu0 %vm521_vm2, %v508_v9  ;;  %816 = vmatprep.subr.mxu0 %v803_v10  ;;  %v686_v30 = vld [vmem:[#allocation10 + $0x40] sm:$0xff]  ;;  %v789_v31 = vld [vmem:[#allocation11 + $0x88] sm:$0xff]  ;;  %v685_v33 = vld [vmem:[#allocation10 + $0x38] sm:$0xff]  ;;  %p1467_p1 = scmp.lt.s32.totalorder %s1919_s29, %s1465_s12  ;;  %p1468_p4 = scmp.lt.s32.totalorder %s1466_s27, %s1460_s8 }
  0xa4   : > { %817 = vmatpush1.msra.mxu0 %v802_v11  ;;  %1165 = vmatpush3.msra.mxu1 %v692_v12  ;;  %v788_v32 = vld [vmem:[#allocation11 + $0x80] sm:$0xff]  ;;  %v787_v34 = vld [vmem:[#allocation11 + $0x78] sm:$0xff]  ;;  %v786_v35 = vld [vmem:[#allocation11 + $0x70] sm:$0xff]  ;;  %p1463_p13 = pneg %p1462_p11 }
  0xa5   : > { %818 = vmatprep.subr.mxu0 %v801_v13  ;;  %1166 = vmatprep.subr.mxu1 %v1582_v0  ;;  %v684_v36 = vld [vmem:[#allocation10 + $0x30] sm:$0xff]  ;;  %v785_v37 = vld [vmem:[#allocation11 + $0x68] sm:$0xff]  ;;  %v784_v38 = vld [vmem:[#allocation11 + $0x60] sm:$0xff]  ;;  %p1469_p6 = por %p1468_p4, %p1467_p1 }
  0xa6   : > { %819 = vmatpush1.msra.mxu0 %v800_v14  ;;  %1167 = vmatpush3.msra.mxu1 %v691_v15  ;;  %v683_v39 = vld [vmem:[#allocation10 + $0x28] sm:$0xff]  ;;  %v783_v40 = vld [vmem:[#allocation11 + $0x58] sm:$0xff]  ;;  %v782_v41 = vld [vmem:[#allocation11 + $0x50] sm:$0xff] }
  0xa7   : > { %820 = vmatprep.subr.mxu0 %v799_v16  ;;  %1168 = vmatprep.subr.mxu1 %v1582_v0  ;;  %v682_v42 = vld [vmem:[#allocation10 + $0x20] sm:$0xff]  ;;  %v781_v43 = vld [vmem:[#allocation11 + $0x48] sm:$0xff]  ;;  %v681_v45 = vld [vmem:[#allocation10 + $0x18] sm:$0xff]  ;;  %p1470_p10 = pnand %p1469_p6, %p1463_p13 }
  0xa8   : > { %821 = vmatpush1.msra.mxu0 %v798_v17  ;;  %1169 = vmatpush3.msra.mxu1 %v690_v18  ;;  %v780_v44 = vld [vmem:[#allocation11 + $0x40] sm:$0xff]  ;;  %v779_v46 = vld [vmem:[#allocation11 + $0x38] sm:$0xff]  ;;  %v778_v47 = vld [vmem:[#allocation11 + $0x30] sm:$0xff] }
  0xa9   : > { %822 = vmatprep.subr.mxu0 %v797_v19  ;;  %1170 = vmatprep.subr.mxu1 %v1582_v0  ;;  %v777_v48 = vld [vmem:[#allocation11 + $0x28] sm:$0xff]  ;;  %v776_v49 = vld [vmem:[#allocation11 + $0x20] sm:$0xff]  ;;  %v775_v50 = vld [vmem:[#allocation11 + $0x18] sm:$0xff] }
  0xaa   : > { %823 = vmatpush1.msra.mxu0 %v796_v20  ;;  %1171 = vmatpush3.msra.mxu1 %v689_v21  ;;  %v680_v51 = vld [vmem:[#allocation10 + $0x10] sm:$0xff]  ;;  %v773_v53 = vld [vmem:[#allocation11 + $0x8] sm:$0xff]  ;;  %v772_v55 = vld [vmem:[#allocation11] sm:$0xff] }
  0xab   : > { %824 = vmatprep.subr.mxu0 %v795_v22  ;;  %1172 = vmatprep.subr.mxu1 %v1582_v0  ;;  %v774_v52 = vld [vmem:[#allocation11 + $0x10] sm:$0xff]  ;;  %v679_v54 = vld [vmem:[#allocation10 + $0x8] sm:$0xff]  ;;  %v678_v56 = vld [vmem:[#allocation10] sm:$0xff] }
  0xac   : > { %825 = vmatpush1.msra.mxu0 %v794_v23  ;;  %1173 = vmatpush3.msra.mxu1 %v688_v24  ;;  %v1108_v57 = vld [vmem:[%s1992_s5] ss:$0 sm:$0xff] }
  0xad   : > { %826 = vmatprep.subr.mxu0 %v793_v25  ;;  %1174 = vmatprep.subr.mxu1 %v1582_v0  ;;  %v1106_v60 = vld [vmem:[%s1990_s3] ss:$0 sm:$0xff] }
  0xae   : > { %827 = vmatpush1.msra.mxu0 %v792_v26  ;;  %1175 = vmatpush3.msra.mxu1 %v687_v27  ;;  %v804_v4 = vld [vmem:[%s1996_s9] sm:$0x3] }
  0xaf   : > { %828 = vmatprep.subr.mxu0 %v791_v28  ;;  %1176 = vmatprep.subr.mxu1 %v1582_v0  ;;  %v1110_v10 = vld [vmem:[%s1994_s7] ss:$0 sm:$0xff] }
  0xb0   : > { %829 = vmatpush1.msra.mxu0 %v790_v29  ;;  %1177 = vmatpush3.msra.mxu1 %v686_v30 }
  0xb1   : > { %830 = vmatprep.subr.mxu0 %v789_v31  ;;  %1178 = vmatprep.subr.mxu1 %v1582_v0 }
  0xb2   : > { %831 = vmatpush1.msra.mxu0 %v788_v32  ;;  %1179 = vmatpush3.msra.mxu1 %v685_v33 }
  0xb3   : > { %832 = vmatprep.subr.mxu0 %v787_v34  ;;  %1180 = vmatprep.subr.mxu1 %v1582_v0 }
  0xb4   : > { %833 = vmatpush1.msra.mxu0 %v786_v35  ;;  %1181 = vmatpush3.msra.mxu1 %v684_v36 }
  0xb5   : > { %834 = vmatprep.subr.mxu0 %v785_v37  ;;  %1182 = vmatprep.subr.mxu1 %v1582_v0 }
  0xb6   : > { %835 = vmatpush1.msra.mxu0 %v784_v38  ;;  %1183 = vmatpush3.msra.mxu1 %v683_v39 }
  0xb7   : > { %836 = vmatprep.subr.mxu0 %v783_v40  ;;  %1184 = vmatprep.subr.mxu1 %v1582_v0 }
  0xb8   : > { %837 = vmatpush1.msra.mxu0 %v782_v41  ;;  %1185 = vmatpush3.msra.mxu1 %v682_v42 }
  0xb9   : > { %838 = vmatprep.subr.mxu0 %v781_v43  ;;  %1186 = vmatprep.subr.mxu1 %v1582_v0 }
  0xba   : > { %839 = vmatpush1.msra.mxu0 %v780_v44  ;;  %1187 = vmatpush3.msra.mxu1 %v681_v45 }
  0xbb   : > { %840 = vmatprep.subr.mxu0 %v779_v46  ;;  %1188 = vmatprep.subr.mxu1 %v1582_v0 }
  0xbc   : > { %841 = vmatpush1.msra.mxu0 %v778_v47  ;;  %880 = vmatprep.mubr.f32.mxu0 %v1582_v0 }
  0xbd   : > { %842 = vmatprep.subr.mxu0 %v777_v48  ;;  %1194 = vmatprep.mubr.msk.f32.mxu1 %vm1583_vm0, %v1582_v0 }
  0xbe   : > { %843 = vmatpush1.msra.mxu0 %v776_v49  ;;  %1189 = vmatpush3.msra.mxu1 %v680_v51 }
  0xbf   : > { %844 = vmatprep.subr.mxu0 %v775_v50  ;;  %1190 = vmatprep.subr.mxu1 %v1582_v0 }
  0xc0   : > { %845 = vmatpush1.msra.mxu0 %v774_v52  ;;  %1191 = vmatpush3.msra.mxu1 %v679_v54 }
  0xc1   : > { %846 = vmatprep.subr.mxu0 %v773_v53  ;;  %1192 = vmatprep.subr.mxu1 %v1582_v0  ;;  %v806_v0 = vlaneseq }
  0xc2   : > { %847 = vmatpush1.msra.mxu0 %v772_v55  ;;  %1193 = vmatpush3.msra.mxu1 %v678_v56 }
  0xc3   : > { %v807_v2 = vshrl.u32 %v806_v0, 7 }
  0xc5   : > { %v808_v3 = vsub.s32 0, %v807_v2  ;;  %v812_v5 = vsub.s32 1, %v807_v2 }
  0xc7   : > { %v809_v6 = vrot.slane %v804_v4, %v808_v3  ;;  %v813_v7 = vrot.slane %v804_v4, %v812_v5 }
 0x15f   : > { %v674_v58 = vpop.f32.mrf.mxu1 }
 0x160   : > { %v675_v59 = vadd.f32 %v1108_v57, %v674_v58 }
 0x161   : > { %v1161_v61 = vpop.f32.mrf.mxu1 }
 0x162   : > { %881 = vmatmul.mubr.f32.vlgmr.msra.gmra.mxu0 %v675_v59 }
 0x163   : > { %v591_v62 = vpop.f32.mrf.mxu0 }
 0x164   : > { %v592_v63 = vadd.f32 %v1106_v60, %v591_v62 }
 0x165   : > { %v1154_v1 = vpop.f32.mrf.mxu0 }
 0x166   : > { %1195 = vmatmul.mubr.f32.vlgmr.msra.gmra.mxu1 %v592_v63 }
 0x222   : > { %v882_v8 = vpop.f32.mrf.mxu0 }
 0x223   : > { %v883_v9 = vadd.f32 %v882_v8, %v809_v6 }
 0x224   : > { %v884_v11 = vpop.f32.mrf.mxu0 }
 0x225   : > { %888 = vst [vmem:[%s507_s30] sm:$0xff] %v883_v9  ;;  %v885_v12 = vadd.f32 %v884_v11, %v813_v7 }
 0x226   : > { %v767_v13 = vpop.f32.mrf.mxu1 }
 0x227   : > { %v768_v14 = vadd.f32 %v1110_v10, %v767_v13  ;;  %889 = vst [vmem:[%s507_s30 + $0x8] sm:$0xff] %v885_v12 }
 0x228   : > { %v1196_v15 = vpop.f32.mrf.mxu1 }
 0x229   : > { %1473 = shalt.err (!%p1470_p10)
}
 0x22a   : > { %s1474_s2 = scalar_lea.hbm %s1917_s24, 256  ;;  %s1478_s21 = scalar_lea.hbm %s1998_s11, 512 }
 0x22b   : > { %p1475_p3 = scmp.ne.s32.totalorder %s1917_s24, %s1474_s2  ;;  %p1479_p8 = scmp.lt.s32.totalorder %s1917_s24, %s1998_s11 }
 0x22c   : > { %p1480_p12 = scmp.lt.s32.totalorder %s1478_s21, %s1474_s2 }
 0x22d   : > { %p1476_p7 = pnand %p1475_p3, %p2034_p9 }
 0x22e   : > { %p1481_p0 = por %p1480_p12, %p1479_p8 }
 0x22f   : > { %p1477_p5 = pneg %p1476_p7 }
 0x231   : > { %p1482_p2 = pnand %p1481_p0, %p1477_p5 }
 0x233   : > { %1485 = shalt.err (!%p1482_p2)
}
 0x234   : > { %1218 = dma.vmem_to_hbm [thread:$0]  (%p2034_p9), %s1919_s29, 256, %s1917_s24, %s896_s16   ;;  %v771_v16 = vmul.f32 0.25, %v768_v14 }
 0x235   : > { %s907_s12 = scalar_lea.hbm %s1997_s10, %s1113_s13  ;;  %s891_s27 = scalar_lea.sflag [#allocation4], %s1840_s22 }
 0x236   : > { %887 = vst [vmem:[%s500_s26] sm:$0xff] %v771_v16  ;;  %s1486_s2 = scalar_lea.vmem %s910_s25, 128  ;;  %s1585_s30 = smov [#allocation13]  }
 0x237   : > { %p1487_p11 = scmp.ne.s32.totalorder %s910_s25, %s1486_s2  ;;  %s1490_s28 = sshll.u32 %s1585_s30, 4  ;;  %s1491_s28 = int_to_ptr.vmem [resolvable:$false] %s1490_s28 }
 0x238   : > { %s1492_s21 = scalar_lea.vmem %s1491_s28, 256  ;;  %p1493_p4 = scmp.lt.s32.totalorder %s910_s25, %s1491_s28 }
 0x239   : > { %p1488_p13 = pnand %p1487_p11, %p2034_p9  ;;  %p1494_p6 = scmp.lt.s32.totalorder %s1492_s21, %s1486_s2 }
 0x23b   : > { %p1489_p1 = pneg %p1488_p13  ;;  %p1495_p10 = por %p1494_p6, %p1493_p4 }
 0x23d   : > { %p1496_p3 = pnand %p1495_p10, %p1489_p1 }
 0x23f   : > { %1499 = shalt.err (!%p1496_p3)
}
 0x240   : > { %s1500_s23 = scalar_lea.hbm %s907_s12, 128  ;;  %s1504_s29 = scalar_lea.hbm %s1997_s10, 256 }
 0x241   : > { %p1501_p7 = scmp.ne.s32.totalorder %s907_s12, %s1500_s23  ;;  %p1505_p12 = scmp.lt.s32.totalorder %s907_s12, %s1997_s10 }
 0x242   : > { %p1506_p0 = scmp.lt.s32.totalorder %s1504_s29, %s1500_s23 }
 0x243   : > { %p1502_p5 = pnand %p1501_p7, %p2034_p9 }
 0x244   : > { %p1507_p2 = por %p1506_p0, %p1505_p12 }
 0x245   : > { %p1503_p8 = pneg %p1502_p5 }
 0x247   : > { %p1508_p11 = pnand %p1507_p2, %p1503_p8 }
 0x249   : > { %1511 = shalt.err (!%p1508_p11)
}
 0x24a   : > { %1217 = dma.vmem_to_hbm [thread:$0]  (%p2034_p9), %s910_s25, 128, %s907_s12, %s891_s27  }
 0x24b PF: > { %s2035_s26 = sld [smem:[#allocation26_spill]]  ;;  %s935_s16 = sand.u32 1, %s1558_s17  }
 0x24c   : > { %p2037_p1 = scmp.ge.s32.totalorder %s1570_s20, 2  ;;  %s936_s6 = scalar_lea.sflag [#allocation4], %s935_s16 }
 0x251   : > { %p2036_p13 = scmp.ne.s32.totalorder %s2035_s26, 0 }
 0x253   : > { %p1242_p4 = pnand %p2037_p1, %p2036_p13 }
 0x255   : > { %p1243_p6 = pneg %p1242_p4 }
 0x257   : > { %1549 = dma.done.wait (%p1243_p6), %s936_s6, 128  }
 0x258   : > { %1551 = vsyncadd (%p1243_p6), %s936_s6, 4294967168  ;;  %s945_s4 = scalar_lea.sflag [#allocation15], %s935_s16 }
 0x259   : > { %1553 = dma.done.wait (%p1243_p6), %s945_s4, 256  }
 0x25a   : > { %1555 = vsyncadd (%p1243_p6), %s945_s4, 4294967040  ;;  %s2038_s20 = sld [smem:[#allocation24_spill]]  ;;  %s2041_s17 = smov %s1562_s18 }
 0x25b   : > { %s2039_s8 = sld [smem:[#allocation23_spill]] }
 0x25c   : > { %s2040_s19 = sld [smem:[#allocation25_spill]] }
 0x260   : > { %p33_p9 = scmp.ge.s32.totalorder %s2038_s20, 4  }
 0x261   : > { %s2042_s18 = smov %s2039_s8 }
 0x262   :  { %35 = sbr.rel (!%p33_p9) target bundleno = 16 (0x10), region = 151 }
 0x267   :  { %950 = vsyncpa [#allocation3], 1 }
 0x268   :  { %952 = vsyncpa [#allocation3 + $0x1], 1 }
 0x269   :  { %953 = vsyncpa [#allocation6], 1 }
 0x26a   :  { %955 = vsyncpa [#allocation6 + $0x1], 1 }
 0x26b   :  { %956 = vsyncpa [#allocation9], 1 }
 0x26c   :  { %957 = vsyncpa [#allocation12], 1 }
 0x26d   :  { %958 = vsyncpa [#allocation4], 1 }
 0x26e   :  { %960 = vsyncpa [#allocation4 + $0x1], 1 }
 0x26f   :  { %961 = vsyncpa [#allocation15], 1 }
 0x270   :  { %963 = vsyncpa [#allocation15 + $0x1], 1 }

</bundles_post_ra>
